<compile_context>
chip_gen: v5e
topology: v5e:2x2
jax: 0.10.0
libtpu: 0.0.40
codegen_flags: <defaults>
</compile_context>

<pallas_src>
import functools

import jax
import jax.numpy as jnp
from jax.experimental import pallas as pl
from jax.experimental.pallas import tpu as pltpu


_VMEM_LIMIT = 48 * 1024 * 1024  # safe on v5e/v6e (128 MiB phys) and v7x (64 MiB phys)


def _round_up(x, m):
    return ((x + m - 1) // m) * m


# ----------------------------------------------------------------------------
# Kernel 1: fused 1x1 convs (key/query head + value head), pixels-major.
#   x block : (TILE_M, C_in)  f32 pixel rows (cast to bf16 in-kernel)
#   w       : (C_in, dk+dv)   bf16, resident across the grid
#   outputs : (TILE_M, dk) and (TILE_M, dv) -- split of one f32-accumulated dot
# ----------------------------------------------------------------------------
def _conv1x1_fused_kernel(x_ref, w_ref, ok_ref, ov_ref, *, dk):
    x = x_ref[...].astype(jnp.bfloat16)                       # (TILE_M, C_in)
    y = jnp.dot(x, w_ref[...], preferred_element_type=jnp.float32)  # (TILE_M, dk+dv)
    ok_ref[...] = y[:, :dk].astype(ok_ref.dtype)
    ov_ref[...] = y[:, dk:].astype(ov_ref.dtype)


def conv1x1_fused(x_nchw, w_fused, dk, *, key_dtype=jnp.bfloat16,
                  value_dtype=jnp.bfloat16, tile_m=256):
    """Bias-free 1x1 convs, both heads in one MXU pass over the input.

    x_nchw  : (N, C_in, H, W)
    w_fused : (C_in, dk+dv)  (key columns first)
    returns (N*H*W, dk), (N*H*W, dv)   pixels-major (image-major, then h, w)
    """
    n, c, h, w = x_nchw.shape
    m = n * h * w
    dv = w_fused.shape[1] - dk
    x_pm = jnp.transpose(x_nchw, (0, 2, 3, 1)).reshape(m, c)  # pixels-major
    tile = min(tile_m, _round_up(m, 8))
    m_pad = _round_up(m, tile)
    if m_pad != m:
        x_pm = jnp.pad(x_pm, ((0, m_pad - m), (0, 0)))
    ok, ov = pl.pallas_call(
        functools.partial(_conv1x1_fused_kernel, dk=dk),
        out_shape=(jax.ShapeDtypeStruct((m_pad, dk), key_dtype),
                   jax.ShapeDtypeStruct((m_pad, dv), value_dtype)),
        grid=(m_pad // tile,),
        in_specs=[
            pl.BlockSpec((tile, c), lambda i: (i, 0)),
            pl.BlockSpec((c, dk + dv), lambda i: (0, 0)),     # weights resident
        ],
        out_specs=(
            pl.BlockSpec((tile, dk), lambda i: (i, 0)),
            pl.BlockSpec((tile, dv), lambda i: (i, 0)),
        ),
        compiler_params=pltpu.CompilerParams(
            dimension_semantics=("parallel",),
            vmem_limit_bytes=_VMEM_LIMIT),
    )(x_pm, w_fused)
    return ok[:m], ov[:m]


# ----------------------------------------------------------------------------
# Kernel 2: fused cross-attention + squared-cdist-mean, one batch TILE per step.
#   q    : (TILE_B*P, dk) bf16, softmax scale pre-folded into the weights
#   k/v  : (Nc, V, dk/dv) bf16, resident across batch tiles
#   qv   : (TILE_B, R, dv) f32
#   out  : (TILE_B, Nc) f32, single store per step
#   Distance collapse (exact):  sum_{p,r}|proto_p - qv_r|^2
#     = R*sum_p|proto_p|^2 + P*sum_r|qv_r|^2 - 2*(sum_p proto_p).(sum_r qv_r)
# ----------------------------------------------------------------------------
def _attn_dist_kernel(q_ref, k_ref, v_ref, qv_ref, o_ref, *, tile_b, p_cnt, r_cnt):
    nc = k_ref.shape[0]
    q = q_ref[...]                                            # (TILE_B*P, dk) bf16
    qv = qv_ref[...]                                          # (TILE_B, R, dv) f32
    m_vec = jnp.sum(qv, axis=1)                               # (TILE_B, dv)
    s2 = jnp.sum(jnp.sum(qv * qv, axis=2), axis=1, keepdims=True)   # (TILE_B, 1)
    inv_pr = 1.0 / float(p_cnt * r_cnt)

    cols = []
    for n in range(nc):                # Nc is small & static (few-shot classes)
        k = k_ref[n]                                          # (V, dk) bf16
        v = v_ref[n]                                          # (V, dv) bf16
        # scores[(b,p), v] = sum_d q[(b,p), d] * k[v, d]   (scale already folded)
        s = jax.lax.dot_general(q, k, (((1,), (1,)), ((), ())),
                                preferred_element_type=jnp.float32)  # (TILE_B*P, V)
        s = s - jnp.max(s, axis=-1, keepdims=True)
        e = jnp.exp(s)
        denom = jnp.sum(e, axis=-1, keepdims=True)
        attn = (e * pl.reciprocal(denom, approx=True)).astype(jnp.bfloat16)
        proto = jnp.dot(attn, v, preferred_element_type=jnp.float32)  # (TILE_B*P, dv)
        proto3 = proto.reshape(tile_b, p_cnt, proto.shape[1])         # (TILE_B, P, dv)
        psq = jnp.sum(jnp.sum(proto3 * proto3, axis=2), axis=1, keepdims=True)
        pm = jnp.sum(proto3, axis=1)                                  # (TILE_B, dv)
        cross = jnp.sum(pm * m_vec, axis=1, keepdims=True)            # (TILE_B, 1)
        cols.append((float(r_cnt) * psq + float(p_cnt) * s2 - 2.0 * cross) * inv_pr)
    o_ref[...] = jnp.concatenate(cols, axis=1)                # one (TILE_B, Nc) store


def attention_distances(q_flat, k_all, v_all, qv, b, tile_b):
    """q_flat: (B_pad*P, dk) bf16 (scale folded); k/v: (Nc, V, dk/dv) bf16;
    qv: (B_pad, R, dv) f32  ->  (B, Nc) f32 mean squared distances."""
    Nc, V, dk = k_all.shape
    dv = v_all.shape[2]
    b_pad, r_cnt, _ = qv.shape
    p_cnt = q_flat.shape[0] // b_pad
    kernel = functools.partial(_attn_dist_kernel,
                               tile_b=tile_b, p_cnt=p_cnt, r_cnt=r_cnt)
    out = pl.pallas_call(
        kernel,
        out_shape=jax.ShapeDtypeStruct((b_pad, Nc), jnp.float32),
        grid=(b_pad // tile_b,),
        in_specs=[
            pl.BlockSpec((tile_b * p_cnt, dk), lambda i: (i, 0)),
            pl.BlockSpec((Nc, V, dk), lambda i: (0, 0, 0)),   # resident across tiles
            pl.BlockSpec((Nc, V, dv), lambda i: (0, 0, 0)),   # resident across tiles
            pl.BlockSpec((tile_b, r_cnt, dv), lambda i: (i, 0, 0)),
        ],
        out_specs=pl.BlockSpec((tile_b, Nc), lambda i: (i, 0)),
        compiler_params=pltpu.CompilerParams(
            dimension_semantics=("parallel",),
            vmem_limit_bytes=_VMEM_LIMIT),
    )(q_flat, k_all, v_all, qv)
    return out[:b]


# ----------------------------------------------------------------------------
# Parameters + full forward (thin plain-JAX glue around the Pallas kernels).
# ----------------------------------------------------------------------------
def init_params(key, ds, dk, dv):
    k1, k2 = jax.random.split(key)
    std = (1.0 / ds) ** 0.5
    # Stored (C_in, C_out): no transpose at call sites.
    key_w = jax.random.normal(k1, (ds, dk), jnp.float32) * std
    value_w = jax.random.normal(k2, (ds, dv), jnp.float32) * std
    # self.query_head = self.key_head (tied) -> query conv reuses key_w.
    return {"key_w": key_w, "value_w": value_w}


def cross_attention_forward(params, query, support):
    """query:   (B, D, H, W)         pre-extracted query feature maps
       support: (Nc, Nk, Ds, Hs, Ws) pre-extracted support feature maps"""
    # TODO(synk): resnet34 feature extractor has no clean Pallas equivalent here;
    # inputs are taken as the feature maps it would produce (identity).
    Nc, Nk, Ds, Hs, Ws = support.shape
    B, D, H, W = query.shape
    dk = params["key_w"].shape[1]
    dv = params["value_w"].shape[1]
    P = H * W
    R = H * W            # PyTorch's .view(B, -1, dv) of the (B, dv, H, W) buffer
    V = Nk * Hs * Ws

    # Fold the softmax dk**-0.5 into the tied key/query weight (dk**-0.25 lands
    # on each side of the q.k product); concat with the value weight so every
    # activation slab does ONE (pixels, C) @ (C, dk+dv) MXU pass.
    w_fused = jnp.concatenate(
        [params["key_w"] * (float(dk) ** -0.25), params["value_w"]],
        axis=1).astype(jnp.bfloat16)

    # Batch tile for attention: multiple of 8, so that M = tile_b*P >= ~128.
    tile_b = min(_round_up(B, 8), max(8, _round_up(pl.cdiv(256, P), 8)))
    b_pad = _round_up(B, tile_b)
    query_p = jnp.pad(query, ((0, b_pad - B), (0, 0), (0, 0), (0, 0)))

    # One fused conv pass per activation slab (pixels-major, fat pixel tiles).
    # q / support-k / support-v come out bf16; qv stays f32 for the distance.
    q_flat, qv_flat = conv1x1_fused(query_p, w_fused, dk,
                                    key_dtype=jnp.bfloat16,
                                    value_dtype=jnp.float32)
    sk_flat, sv_flat = conv1x1_fused(support.reshape(Nc * Nk, Ds, Hs, Ws),
                                     w_fused, dk,
                                     key_dtype=jnp.bfloat16,
                                     value_dtype=jnp.bfloat16)

    # Per-class support keys/values.  The support-pixel enumeration (shot-major)
    # differs from PyTorch's permute+view (spatial-major), but k and v share it
    # and softmax + weighted sum over that axis is permutation-invariant.
    k_all = sk_flat.reshape(Nc, V, dk)
    v_all = sv_flat.reshape(Nc, V, dv)

    # PyTorch's query_value.view(B, -1, dv) row-major-reinterprets the NCHW
    # buffer (mixing channel and spatial axes); reproduce it faithfully:
    # channel-major, then reshape.  Tiny (B, P, dv) swap in the wrapper.
    qv_view = jnp.swapaxes(qv_flat.reshape(b_pad, P, dv), 1, 2).reshape(b_pad, R, dv)

    return attention_distances(q_flat, k_all, v_all, qv_view, B, tile_b)  # (B, Nc)


# ----------------------------------------------------------------------------
# Pure-JAX reference (f32, mirrors the PyTorch module op-for-op).
# ----------------------------------------------------------------------------
def _reference_forward(params, query, support):
    Nc, Nk, Ds, Hs, Ws = support.shape
    B, D, H, W = query.shape
    wk, wv = params["key_w"], params["value_w"]
    dk, dv = wk.shape[1], wv.shape[1]

    def conv(x, w):
        return jnp.einsum("bchw,cd->bdhw", x, w)

    sf = support.reshape(Nc * Nk, Ds, Hs, Ws)
    q = conv(query, wk).reshape(B, dk, H * W)
    sk = conv(sf, wk).reshape(Nc, Nk, dk, Hs * Ws)
    sv = conv(sf, wv).reshape(Nc, Nk, dv, Hs * Ws)
    sk = jnp.transpose(sk, (0, 2, 3, 1)).reshape(Nc, dk, -1)
    sv = jnp.transpose(sv, (0, 2, 3, 1)).reshape(Nc, dv, -1)
    attn = jnp.einsum("bdp,ndv->bnpv", q, sk) * dk ** -0.5
    attn = jax.nn.softmax(attn, axis=-1)
    proto = jnp.einsum("bnpv,ndv->bnpd", attn, sv)            # (B, Nc, P, dv)
    qv = conv(query, wv).reshape(B, -1, dv)                   # faithful .view
    diff = proto[:, :, :, None, :] - qv[:, None, None, :, :]
    d2 = jnp.sum(diff * diff, axis=-1)                        # (B, Nc, P, R)
    return jnp.mean(d2, axis=(2, 3))


if __name__ == "__main__":
    # Small shapes consistent with the module (real config: D=Ds=512, dk=dv=128).
    B, Nc, Nk = 2, 3, 2
    D = Ds = 32
    H = W = 4
    Hs = Ws = 4
    dk = dv = 16

    key = jax.random.PRNGKey(0)
    kq, ks, kp = jax.random.split(key, 3)
    query = jax.random.normal(kq, (B, D, H, W), jnp.float32)
    support = jax.random.normal(ks, (Nc, Nk, Ds, Hs, Ws), jnp.float32)
    params = init_params(kp, Ds, dk, dv)

    distances = cross_attention_forward(params, query, support)
    distances = jax.block_until_ready(distances)

    assert distances.shape == (B, Nc), distances.shape
    assert bool(jnp.all(jnp.isfinite(distances)))

    # Loose tolerance: kernels use bf16 MXU operands with f32 accumulation.
    ref = _reference_forward(params, query, support)
    assert bool(jnp.allclose(distances, ref, rtol=0.1, atol=0.1)), (distances, ref)

    print("KERNEL_OK")
</pallas_src>

<mosaic_0001>
module attributes {stable_mosaic.version = 11 : i64} {
  func.func @_conv1x1_fused_kernel(%arg0: i32, %arg1: memref<128x32xf32, #tpu.memory_space<vmem>>, %arg2: memref<32x32xbf16, #tpu.memory_space<vmem>>, %arg3: memref<128x16xbf16, #tpu.memory_space<vmem>>, %arg4: memref<128x16xf32, #tpu.memory_space<vmem>>) attributes {dimension_semantics = [#tpu.dimension_semantics<parallel>], iteration_bounds = array<i64: 1>, scalar_prefetch = 0 : i64, scratch_operands = 0 : i64, tpu.core_type = #tpu.core_type<tc>, window_params = [{transform_indices = @transform_0, window_bounds = array<i64: 128, 32>}, {pipeline_mode = #tpu.pipeline_mode<synchronous>, transform_indices = @transform_1, window_bounds = array<i64: 32, 32>}, {transform_indices = @transform_2, window_bounds = array<i64: 128, 16>}, {transform_indices = @transform_3, window_bounds = array<i64: 128, 16>}]} {
    %c0 = arith.constant 0 : index
    %c0_0 = arith.constant 0 : index
    %0 = vector.load %arg1[%c0, %c0_0] : memref<128x32xf32, #tpu.memory_space<vmem>>, vector<128x32xf32>
    %1 = arith.truncf %0 : vector<128x32xf32> to vector<128x32xbf16>
    %c0_1 = arith.constant 0 : index
    %c0_2 = arith.constant 0 : index
    %2 = vector.load %arg2[%c0_1, %c0_2] : memref<32x32xbf16, #tpu.memory_space<vmem>>, vector<32x32xbf16>
    %cst = arith.constant dense<0.000000e+00> : vector<128x32xf32>
    %3 = tpu.matmul %1, %2, %cst {dimension_numbers = #tpu.dot_dimension_numbers<[1], [0], [0], [1], [0, 0, 1, 1], [], []>} : vector<128x32xbf16>, vector<32x32xbf16>, vector<128x32xf32> -> vector<128x32xf32>
    %4 = vector.extract_strided_slice %3 {offsets = [0, 0], sizes = [128, 16], strides = [1, 1]} : vector<128x32xf32> to vector<128x16xf32>
    %5 = arith.truncf %4 : vector<128x16xf32> to vector<128x16xbf16>
    %c0_3 = arith.constant 0 : index
    %c0_4 = arith.constant 0 : index
    %6 = vector.load %arg3[%c0_3, %c0_4] : memref<128x16xbf16, #tpu.memory_space<vmem>>, vector<128x16xbf16>
    tpu.vector_store %arg3[%c0_3, %c0_4], %5 {strides = array<i32>} : memref<128x16xbf16, #tpu.memory_space<vmem>>, vector<128x16xbf16>,
    %7 = vector.extract_strided_slice %3 {offsets = [0, 16], sizes = [128, 16], strides = [1, 1]} : vector<128x32xf32> to vector<128x16xf32>
    %c0_5 = arith.constant 0 : index
    %c0_6 = arith.constant 0 : index
    %8 = vector.load %arg4[%c0_5, %c0_6] : memref<128x16xf32, #tpu.memory_space<vmem>>, vector<128x16xf32>
    tpu.vector_store %arg4[%c0_5, %c0_6], %7 {strides = array<i32>} : memref<128x16xf32, #tpu.memory_space<vmem>>, vector<128x16xf32>,
    return
  }
  func.func @transform_0(%arg0: i32) -> (i32, i32) {
    %c0_i32 = arith.constant 0 : i32
    %c0_i32_0 = arith.constant 0 : i32
    return %arg0, %c0_i32 : i32, i32
  }
  func.func @transform_1(%arg0: i32) -> (i32, i32) {
    %c0_i32 = arith.constant 0 : i32
    %c0_i32_0 = arith.constant 0 : i32
    %c0_i32_1 = arith.constant 0 : i32
    return %c0_i32, %c0_i32_0 : i32, i32
  }
  func.func @transform_2(%arg0: i32) -> (i32, i32) {
    %c0_i32 = arith.constant 0 : i32
    %c0_i32_0 = arith.constant 0 : i32
    return %arg0, %c0_i32 : i32, i32
  }
  func.func @transform_3(%arg0: i32) -> (i32, i32) {
    %c0_i32 = arith.constant 0 : i32
    %c0_i32_0 = arith.constant 0 : i32
    return %arg0, %c0_i32 : i32, i32
  }
}

</mosaic_0001>

<bundles_post_ra>
// kernel: tpu_custom_call.1
= control target key start
LH: loop header
LB: loop body
LE: loop exit
PB: predicated region body
PF: predicated region fallthrough
CT: control target
= control target key end

     0   :  { %vm54_vm0 = vcmask 261120   ;;  %vm144_vm1 = vcmask 125952   ;;  %s275_s20 = smov 112   ;;  %vm225_vm2 = vcmask 130048   ;;  %s502_s1 = inlined_call_operand.vmem [shape: bf16[32,32], index: 1, kind: input, shape index: {}]   ;;  %s503_s0 = inlined_call_operand.vmem [shape: f32[128,32], index: 0, kind: input, shape index: {}]   ;;  %s504_s2 = inlined_call_operand.vmem [shape: bf16[128,16], index: 2, kind: output, shape index: {0}]   ;;  %s505_s3 = inlined_call_operand.vmem [shape: f32[128,16], index: 3, kind: output, shape index: {1}]  }
   0x1   :  { %v267_v0 = vld [vmem:[%s502_s1 + $0x8] sm:$0xff]  ;;  %v266_v1 = vld [vmem:[%s502_s1] sm:$0xff]  ;;  %v16_v14 = vld [vmem:[%s503_s0 + $0x10] sm:$0xff] }
   0x2   :  { %v14_v2 = vld [vmem:[%s503_s0] sm:$0xff]  ;;  %v15_v3 = vld [vmem:[%s503_s0 + $0x8] sm:$0xff]  ;;  %85 = vmatpush.bf16.msra.mxu0 %v267_v0  ;;  %268 = vmatpush.bf16.msra.mxu1 %v267_v0  ;;  %v17_v15 = vld [vmem:[%s503_s0 + $0x18] sm:$0xff] }
   0x3   :  { %v18_v4 = vld [vmem:[%s503_s0 + $0x20] sm:$0xff]  ;;  %v19_v5 = vld [vmem:[%s503_s0 + $0x28] sm:$0xff]  ;;  %269 = vmatpush.bf16.msra.mxu2 %v267_v0  ;;  %270 = vmatpush.bf16.msra.mxu3 %v267_v0  ;;  %v30_v10 = vpack.c.bf16 %v15_v3, %v14_v2  ;;  %v24_v16 = vld [vmem:[%s503_s0 + $0x50] sm:$0xff]  ;;  %v31_v22 = vpack.c.bf16 %v17_v15, %v16_v14 }
   0x4   :  { %v22_v6 = vld [vmem:[%s503_s0 + $0x40] sm:$0xff]  ;;  %v23_v7 = vld [vmem:[%s503_s0 + $0x48] sm:$0xff]  ;;  %v32_v11 = vpack.c.bf16 %v19_v5, %v18_v4  ;;  %v20_v17 = vld [vmem:[%s503_s0 + $0x30] sm:$0xff] }
   0x5   :  { %v26_v8 = vld [vmem:[%s503_s0 + $0x60] sm:$0xff]  ;;  %v27_v9 = vld [vmem:[%s503_s0 + $0x68] sm:$0xff]  ;;  %v34_v12 = vpack.c.bf16 %v23_v7, %v22_v6  ;;  %v21_v18 = vld [vmem:[%s503_s0 + $0x38] sm:$0xff] }
   0x6   :  { %86 = vmatpush.bf16.msra.mxu0 %v266_v1  ;;  %271 = vmatpush.bf16.msra.mxu1 %v266_v1  ;;  %v36_v13 = vpack.c.bf16 %v27_v9, %v26_v8  ;;  %v25_v19 = vld [vmem:[%s503_s0 + $0x58] sm:$0xff]  ;;  %v28_v20 = vld [vmem:[%s503_s0 + $0x70] sm:$0xff]  ;;  %v33_v23 = vpack.c.bf16 %v21_v18, %v20_v17 }
   0x7   :  { %272 = vmatpush.bf16.msra.mxu2 %v266_v1  ;;  %273 = vmatpush.bf16.msra.mxu3 %v266_v1  ;;  %v29_v21 = vld [vmem:[%s503_s0 + $0x78] sm:$0xff]  ;;  %v35_v24 = vpack.c.bf16 %v25_v19, %v24_v16 }
   0x8   :  { %v37_v25 = vpack.c.bf16 %v29_v21, %v28_v20 }
   0x9   :  { %258 = vmatmul.msk.bf16.vlgmr.msra.gmra.mxu0 %vm54_vm0, %v30_v10  ;;  %260 = vmatmul.msk.bf16.vlgmr.msra.gmra.mxu1 %vm54_vm0, %v32_v11 }
   0xa   :  { %262 = vmatmul.msk.bf16.vlgmr.msra.gmra.mxu2 %vm54_vm0, %v34_v12  ;;  %264 = vmatmul.msk.bf16.vlgmr.msra.gmra.mxu3 %vm54_vm0, %v36_v13 }
  0x19   :  { %259 = vmatmul.msk.bf16.gmra.mxu0 %vm54_vm0, %v31_v22  ;;  %261 = vmatmul.msk.bf16.gmra.mxu1 %vm54_vm0, %v33_v23 }
  0x1a   :  { %263 = vmatmul.msk.bf16.gmra.mxu2 %vm54_vm0, %v35_v24  ;;  %265 = vmatmul.msk.bf16.gmra.mxu3 %vm54_vm0, %v37_v25 }
  0x86   :  { %v88_v26 = vpop.f32.mrf.mxu0  ;;  %v98_v27 = vpop.f32.mrf.mxu1 }
  0x87   :  { %v128_v28 = vpack.c.bf16 %v88_v26, %v88_v26  ;;  %v132_v29 = vpack.c.bf16 %v98_v27, %v98_v27  ;;  %185 = vrot.lane.b32.xlu2 %v98_v27, %s275_s20  ;;  %177 = vrot.lane.b32.xlu0 %v88_v26, %s275_s20 }
  0x89   :  { %145 = vst.msk [vmem:[%s504_s2] sm:$0xf] %vm144_vm1, %v128_v28 }
  0x8a   :  { %149 = vst.msk [vmem:[%s504_s2 + $0x10] sm:$0xf] %vm144_vm1, %v132_v29 }
  0x8d   :  { %v108_v30 = vpop.f32.mrf.mxu2  ;;  %v118_v31 = vpop.f32.mrf.mxu3 }
  0x8e   :  { %v136_v32 = vpack.c.bf16 %v108_v30, %v108_v30  ;;  %v90_v33 = vpop.f32.mrf.mxu0  ;;  %v140_v34 = vpack.c.bf16 %v118_v31, %v118_v31  ;;  %v100_v35 = vpop.f32.mrf.mxu1 }
  0x8f   :  { %v129_v36 = vpack.c.bf16 %v90_v33, %v90_v33  ;;  %193 = vrot.lane.b32.xlu2 %v108_v30, %s275_s20  ;;  %201 = vrot.lane.b32.xlu0 %v118_v31, %s275_s20  ;;  %v133_v37 = vpack.c.bf16 %v100_v35, %v100_v35 }
  0x90   :  { %153 = vst.msk [vmem:[%s504_s2 + $0x20] sm:$0xf] %vm144_vm1, %v136_v32 }
  0x91   :  { %146 = vst.msk [vmem:[%s504_s2 + $0x4] sm:$0xf] %vm144_vm1, %v129_v36 }
  0x92   :  { %157 = vst.msk [vmem:[%s504_s2 + $0x30] sm:$0xf] %vm144_vm1, %v140_v34 }
  0x93   :  { %150 = vst.msk [vmem:[%s504_s2 + $0x14] sm:$0xf] %vm144_vm1, %v133_v37 }
  0x95   :  { %v110_v38 = vpop.f32.mrf.mxu2  ;;  %v120_v39 = vpop.f32.mrf.mxu3 }
  0x96   :  { %v137_v40 = vpack.c.bf16 %v110_v38, %v110_v38  ;;  %v93_v41 = vpop.f32.mrf.mxu0  ;;  %v141_v42 = vpack.c.bf16 %v120_v39, %v120_v39  ;;  %v103_v43 = vpop.f32.mrf.mxu1 }
  0x97   :  { %v130_v44 = vpack.c.bf16 %v93_v41, %v93_v41  ;;  %187 = vrot.lane.b32.xlu2 %v100_v35, %s275_s20  ;;  %179 = vrot.lane.b32.xlu0 %v90_v33, %s275_s20  ;;  %v134_v45 = vpack.c.bf16 %v103_v43, %v103_v43 }
  0x98   :  { %154 = vst.msk [vmem:[%s504_s2 + $0x24] sm:$0xf] %vm144_vm1, %v137_v40  ;;  %181 = vrot.lane.b32.xlu1 %v93_v41, %s275_s20 }
  0x99   :  { %147 = vst.msk [vmem:[%s504_s2 + $0x8] sm:$0xf] %vm144_vm1, %v130_v44 }
  0x9a   :  { %158 = vst.msk [vmem:[%s504_s2 + $0x34] sm:$0xf] %vm144_vm1, %v141_v42 }
  0x9b   :  { %151 = vst.msk [vmem:[%s504_s2 + $0x18] sm:$0xf] %vm144_vm1, %v134_v45 }
  0x9d   :  { %v113_v46 = vpop.f32.mrf.mxu2  ;;  %v123_v47 = vpop.f32.mrf.mxu3 }
  0x9e   :  { %v138_v48 = vpack.c.bf16 %v113_v46, %v113_v46  ;;  %v95_v49 = vpop.f32.mrf.mxu0  ;;  %v105_v50 = vpop.f32.mrf.mxu1  ;;  %v142_v53 = vpack.c.bf16 %v123_v47, %v123_v47 }
  0x9f   :  { %v131_v51 = vpack.c.bf16 %v95_v49, %v95_v49  ;;  %195 = vrot.lane.b32.xlu0 %v110_v38, %s275_s20  ;;  %v135_v52 = vpack.c.bf16 %v105_v50, %v105_v50 }
  0xa0   :  { %155 = vst.msk [vmem:[%s504_s2 + $0x28] sm:$0xf] %vm144_vm1, %v138_v48  ;;  %197 = vrot.lane.b32.xlu1 %v113_v46, %s275_s20 }
  0xa1   :  { %148 = vst.msk [vmem:[%s504_s2 + $0xc] sm:$0xf] %vm144_vm1, %v131_v51 }
  0xa2   :  { %152 = vst.msk [vmem:[%s504_s2 + $0x1c] sm:$0xf] %vm144_vm1, %v135_v52 }
  0xa3   :  { %159 = vst.msk [vmem:[%s504_s2 + $0x38] sm:$0xf] %vm144_vm1, %v142_v53 }
  0xa5   :  { %v115_v54 = vpop.f32.mrf.mxu2  ;;  %v125_v55 = vpop.f32.mrf.mxu3 }
  0xa6   :  { %v139_v56 = vpack.c.bf16 %v115_v54, %v115_v54  ;;  %199 = vrot.lane.b32.xlu2 %v115_v54, %s275_s20  ;;  %v143_v57 = vpack.c.bf16 %v125_v55, %v125_v55 }
  0xa7   :  { %189 = vrot.lane.b32.xlu0 %v103_v43, %s275_s20 }
  0xa8   :  { %156 = vst.msk [vmem:[%s504_s2 + $0x2c] sm:$0xf] %vm144_vm1, %v139_v56  ;;  %183 = vrot.lane.b32.xlu1 %v95_v49, %s275_s20 }
  0xa9   :  { %160 = vst.msk [vmem:[%s504_s2 + $0x3c] sm:$0xf] %vm144_vm1, %v143_v57 }
  0xae   :  { %205 = vrot.lane.b32.xlu2 %v123_v47, %s275_s20 }
  0xaf   :  { %207 = vrot.lane.b32.xlu0 %v125_v55, %s275_s20 }
  0xb0   :  { %191 = vrot.lane.b32.xlu1 %v105_v50, %s275_s20 }
  0xb8   :  { %203 = vrot.lane.b32.xlu1 %v120_v39, %s275_s20 }
  0xe1   :  { %v186_v58 = vpop.permute.xlu2 %185 }
  0xe2   :  { %230 = vst.msk [vmem:[%s505_s3 + $0x20] sm:$0xff] %vm225_vm2, %v186_v58 }
  0xe9   :  { %v194_v59 = vpop.permute.xlu2 %193 }
  0xea   :  { %234 = vst.msk [vmem:[%s505_s3 + $0x40] sm:$0xff] %vm225_vm2, %v194_v59 }
  0xf1   :  { %v188_v60 = vpop.permute.xlu2 %187 }
  0xf2   :  { %231 = vst.msk [vmem:[%s505_s3 + $0x28] sm:$0xff] %vm225_vm2, %v188_v60 }
  0xf9   :  { %v178_v61 = vpop.permute.xlu0 %177 }
  0xfa   :  { %226 = vst.msk [vmem:[%s505_s3] sm:$0xff] %vm225_vm2, %v178_v61 }
 0x100   :  { %v200_v62 = vpop.permute.xlu2 %199 }
 0x101   :  { %237 = vst.msk [vmem:[%s505_s3 + $0x58] sm:$0xff] %vm225_vm2, %v200_v62  ;;  %v202_v63 = vpop.permute.xlu0 %201 }
 0x102   :  { %238 = vst.msk [vmem:[%s505_s3 + $0x60] sm:$0xff] %vm225_vm2, %v202_v63 }
 0x108   :  { %v206_v0 = vpop.permute.xlu2 %205 }
 0x109   :  { %240 = vst.msk [vmem:[%s505_s3 + $0x70] sm:$0xff] %vm225_vm2, %v206_v0  ;;  %v180_v1 = vpop.permute.xlu0 %179 }
 0x10a   :  { %227 = vst.msk [vmem:[%s505_s3 + $0x8] sm:$0xff] %vm225_vm2, %v180_v1  ;;  %v182_v2 = vpop.permute.xlu1 %181 }
 0x10b   :  { %228 = vst.msk [vmem:[%s505_s3 + $0x10] sm:$0xff] %vm225_vm2, %v182_v2 }
 0x111   :  { %v196_v3 = vpop.permute.xlu0 %195 }
 0x112   :  { %235 = vst.msk [vmem:[%s505_s3 + $0x48] sm:$0xff] %vm225_vm2, %v196_v3  ;;  %v198_v4 = vpop.permute.xlu1 %197 }
 0x113   :  { %236 = vst.msk [vmem:[%s505_s3 + $0x50] sm:$0xff] %vm225_vm2, %v198_v4 }
 0x119   :  { %v190_v5 = vpop.permute.xlu0 %189 }
 0x11a   :  { %232 = vst.msk [vmem:[%s505_s3 + $0x30] sm:$0xff] %vm225_vm2, %v190_v5  ;;  %v184_v6 = vpop.permute.xlu1 %183 }
 0x11b   :  { %229 = vst.msk [vmem:[%s505_s3 + $0x18] sm:$0xff] %vm225_vm2, %v184_v6 }
 0x121   :  { %v208_v7 = vpop.permute.xlu0 %207 }
 0x122   :  { %241 = vst.msk [vmem:[%s505_s3 + $0x78] sm:$0xff] %vm225_vm2, %v208_v7  ;;  %v192_v8 = vpop.permute.xlu1 %191 }
 0x123   :  { %233 = vst.msk [vmem:[%s505_s3 + $0x38] sm:$0xff] %vm225_vm2, %v192_v8 }
 0x12a   :  { %v204_v9 = vpop.permute.xlu1 %203 }
 0x12b   :  { %239 = vst.msk [vmem:[%s505_s3 + $0x68] sm:$0xff] %vm225_vm2, %v204_v9 }

</bundles_post_ra>
